<compile_context>
chip_gen: v7x
topology: tpu7x:2x2x1
jax: 0.10.0
libtpu: 0.0.40
codegen_flags: <defaults>
</compile_context>

<pallas_src>
import functools

import jax
import jax.numpy as jnp
from jax.experimental import pallas as pl
from jax.experimental.pallas import tpu as pltpu

_NEG_INF = float("-inf")


def _ce_kernel(labels_ref, logits_ref, loss_ref, m_scr, l_scr, picked_scr,
               *, n_rows, n_cols, tile_n, tile_c):
    i = pl.program_id(0)                        # row-tile index ("parallel")
    j = pl.program_id(1)                        # class-tile index (reduction)
    num_c_tiles = (n_cols + tile_c - 1) // tile_c      # static Python int

    @pl.when(j == 0)
    def _init():
        m_scr[...] = jnp.full(m_scr.shape, _NEG_INF, dtype=jnp.float32)
        l_scr[...] = jnp.zeros(l_scr.shape, dtype=jnp.float32)
        picked_scr[...] = jnp.zeros(picked_scr.shape, dtype=jnp.float32)

    x_raw = logits_ref[...].astype(jnp.float32)        # (tile_n, tile_c), in-register upcast
    # Target-class position relative to this class tile: a (tile_n, 1) per-row
    # subtract instead of adding j*tile_c to a (tile_n, tile_c) iota.
    rel_labels = labels_ref[...] - j * tile_c          # (tile_n, 1) int32

    def _update(x):
        # Online logsumexp over the class (lane) axis + target-logit pick-up.
        # Precondition (torch contract): labels in [0, C)  ->  `hit` can never
        # fire on a padded lane, so no class-validity mask is needed here.
        col = jax.lax.broadcasted_iota(jnp.int32, x.shape, 1)
        hit = col == rel_labels
        m_prev = m_scr[...]
        m_new = jnp.maximum(m_prev, jnp.max(x, axis=-1, keepdims=True))
        p = jnp.exp(x - m_new)                          # EUP
        l_scr[...] = (jnp.exp(m_prev - m_new) * l_scr[...]
                      + jnp.sum(p, axis=-1, keepdims=True))
        picked_scr[...] += jnp.sum(jnp.where(hit, x, 0.0), axis=-1, keepdims=True)
        m_scr[...] = m_new

    if n_cols % tile_c != 0:
        # Only the ragged last class tile pays for the -inf masking; interior
        # tiles take the unmasked fast path.
        last_valid = n_cols - (num_c_tiles - 1) * tile_c   # static

        @pl.when(j == num_c_tiles - 1)
        def _masked_tile():
            col = jax.lax.broadcasted_iota(jnp.int32, x_raw.shape, 1)
            _update(jnp.where(col < last_valid, x_raw, _NEG_INF))

        @pl.when(j != num_c_tiles - 1)
        def _interior_tile():
            _update(x_raw)
    else:
        _update(x_raw)

    @pl.when(j == num_c_tiles - 1)
    def _finalize():
        lse = jnp.log(l_scr[...]) + m_scr[...]
        per_row = lse - picked_scr[...]                    # (tile_n, 1)
        if n_rows % tile_n != 0:
            # Padded rows of a ragged last row tile ran on garbage block
            # contents; zero them with a SELECT so NaN/Inf cannot propagate.
            row = jax.lax.broadcasted_iota(jnp.int32, per_row.shape, 0) + i * tile_n
            per_row = jnp.where(row < n_rows, per_row, 0.0)
        loss_ref[...] = per_row.astype(loss_ref.dtype)


def _round_up(x, m):
    return ((x + m - 1) // m) * m


def cross_entropy_loss(logits, labels, *, tile_n=None, tile_c=None,
                       vmem_limit_bytes=48 * 1024 * 1024):
    """Mean cross-entropy. logits: (N, C) f32/bf16; labels: (N,) int ids in [0, C)."""
    n, c = logits.shape
    itemsize = jnp.dtype(logits.dtype).itemsize

    # Dtype-aware defaults: ~8 MiB logits block (16 MiB double-buffered), which
    # fits the explicit 48 MiB VMEM limit on v5e / v6e / v7x alike.
    if tile_n is None:
        tile_n = 128
    if tile_c is None:
        tile_c = 32768 if itemsize <= 2 else 16384

    # Blocks must be (8,128)-multiples OR the full extent; clamp to full extent
    # for small problems.
    if c <= tile_c:
        tile_c = c
    if n <= tile_n:
        if n >= 16:
            # Keep >= 2 row tiles so the "parallel" axis can span both v7x TCs.
            tile_n = _round_up(pl.cdiv(n, 2), 8)
        else:
            tile_n = n

    labels2d = labels.astype(jnp.int32).reshape(n, 1)
    grid = (pl.cdiv(n, tile_n), pl.cdiv(c, tile_c))

    kernel = functools.partial(_ce_kernel, n_rows=n, n_cols=c,
                               tile_n=tile_n, tile_c=tile_c)

    bytes_accessed = logits.size * itemsize + labels2d.size * 4 + n * 4

    per_row = pl.pallas_call(
        kernel,
        out_shape=jax.ShapeDtypeStruct((n, 1), jnp.float32),
        grid_spec=pltpu.PrefetchScalarGridSpec(
            num_scalar_prefetch=0,
            grid=grid,
            in_specs=[
                pl.BlockSpec((tile_n, 1), lambda i, j: (i, 0)),        # labels
                pl.BlockSpec((tile_n, tile_c), lambda i, j: (i, j)),   # logits
            ],
            # Tiny (N,1) per-row output kept (it is resident across the class
            # sweep and written once per row tile).
            out_specs=pl.BlockSpec((tile_n, 1), lambda i, j: (i, 0)),
            scratch_shapes=[
                pltpu.VMEM((tile_n, 1), jnp.float32),   # running max  m
                pltpu.VMEM((tile_n, 1), jnp.float32),   # running sum  l
                pltpu.VMEM((tile_n, 1), jnp.float32),   # picked target logit
            ],
        ),
        compiler_params=pltpu.CompilerParams(
            dimension_semantics=("parallel", "arbitrary"),
            vmem_limit_bytes=vmem_limit_bytes,
        ),
        cost_estimate=pl.CostEstimate(
            flops=5 * n * c,
            transcendentals=n * c,
            bytes_accessed=bytes_accessed,
        ),
    )(labels2d, logits)

    # One global reduction + one divide by the TRUE N (not the tile size).
    # TODO(synk): torch ignore_index / class weights / label smoothing and the
    # out-of-range-label error are not implemented (nn.CrossEntropyLoss defaults
    # assumed; labels must lie in [0, C)).
    return jnp.sum(per_row) / jnp.float32(n)


def _reference(logits, labels):
    logp = jax.nn.log_softmax(logits.astype(jnp.float32), axis=-1)
    return -jnp.mean(jnp.take_along_axis(logp, labels[:, None], axis=-1))


if __name__ == "__main__":
    key = jax.random.PRNGKey(0)
    k1, k2, k3, k4, k5, k6 = jax.random.split(key, 6)

    # Case 1: tiny single-block problem (the module's toy usage).
    n1, c1 = 8, 32
    logits1 = jax.random.normal(k1, (n1, c1), dtype=jnp.float32)
    labels1 = jax.random.randint(k2, (n1,), 0, c1, dtype=jnp.int32)
    loss1 = jax.block_until_ready(cross_entropy_loss(logits1, labels1))
    ref1 = _reference(logits1, labels1)
    assert jnp.allclose(loss1, ref1, atol=1e-5, rtol=1e-5), (loss1, ref1)

    # Case 2: multiple row/class tiles with ragged edges on both axes (f32).
    n2, c2 = 20, 200
    logits2 = jax.random.normal(k3, (n2, c2), dtype=jnp.float32)
    labels2 = jax.random.randint(k4, (n2,), 0, c2, dtype=jnp.int32)
    loss2 = jax.block_until_ready(
        cross_entropy_loss(logits2, labels2, tile_n=8, tile_c=128))
    ref2 = _reference(logits2, labels2)
    assert jnp.allclose(loss2, ref2, atol=1e-5, rtol=1e-5), (loss2, ref2)

    # Case 3: bf16 logits, interior fast path (C % tile_c == 0), >= 2 row tiles.
    n3, c3 = 16, 384
    logits3 = jax.random.normal(k5, (n3, c3), dtype=jnp.float32).astype(jnp.bfloat16)
    labels3 = jax.random.randint(k6, (n3,), 0, c3, dtype=jnp.int32)
    loss3 = jax.block_until_ready(
        cross_entropy_loss(logits3, labels3, tile_n=8, tile_c=128))
    ref3 = _reference(logits3, labels3)
    assert jnp.allclose(loss3, ref3, atol=1e-4, rtol=1e-4), (loss3, ref3)

    print("KERNEL_OK")
</pallas_src>

<mosaic_0001>
module attributes {stable_mosaic.version = 11 : i64} {
  func.func @_ce_kernel(%arg0: i32, %arg1: i32, %arg2: memref<8x1xi32, #tpu.memory_space<vmem>>, %arg3: memref<8x32xf32, #tpu.memory_space<vmem>>, %arg4: memref<8x1xf32, #tpu.memory_space<vmem>>, %arg5: memref<8x1xf32, #tpu.memory_space<vmem>>, %arg6: memref<8x1xf32, #tpu.memory_space<vmem>>, %arg7: memref<8x1xf32, #tpu.memory_space<vmem>>) attributes {dimension_semantics = [#tpu.dimension_semantics<parallel>, #tpu.dimension_semantics<arbitrary>], iteration_bounds = array<i64: 1, 1>, scalar_prefetch = 0 : i64, scratch_operands = 3 : i64, tpu.core_type = #tpu.core_type<tc>, window_params = [{transform_indices = @transform_0, window_bounds = array<i64: 8, 1>}, {transform_indices = @transform_1, window_bounds = array<i64: 8, 32>}, {transform_indices = @transform_2, window_bounds = array<i64: 8, 1>}]} {
    %c0_i32 = arith.constant 0 : i32
    %0 = arith.cmpi eq, %arg1, %c0_i32 : i32
    %1 = arith.extui %0 : i1 to i32
    %c0_i32_0 = arith.constant 0 : i32
    %2 = arith.cmpi ne, %1, %c0_i32_0 : i32
    scf.if %2 {
      %cst_21 = arith.constant 0xFF800000 : f32
      %37 = vector.broadcast %cst_21 : f32 to vector<8x1xf32>
      %c0_22 = arith.constant 0 : index
      %c0_23 = arith.constant 0 : index
      %38 = vector.load %arg5[%c0_22, %c0_23] : memref<8x1xf32, #tpu.memory_space<vmem>>, vector<8x1xf32>
      tpu.vector_store %arg5[%c0_22, %c0_23], %37 {strides = array<i32>} : memref<8x1xf32, #tpu.memory_space<vmem>>, vector<8x1xf32>,
      %cst_24 = arith.constant 0.000000e+00 : f32
      %39 = vector.broadcast %cst_24 : f32 to vector<8x1xf32>
      %c0_25 = arith.constant 0 : index
      %c0_26 = arith.constant 0 : index
      %40 = vector.load %arg6[%c0_25, %c0_26] : memref<8x1xf32, #tpu.memory_space<vmem>>, vector<8x1xf32>
      tpu.vector_store %arg6[%c0_25, %c0_26], %39 {strides = array<i32>} : memref<8x1xf32, #tpu.memory_space<vmem>>, vector<8x1xf32>,
      %cst_27 = arith.constant 0.000000e+00 : f32
      %41 = vector.broadcast %cst_27 : f32 to vector<8x1xf32>
      %c0_28 = arith.constant 0 : index
      %c0_29 = arith.constant 0 : index
      %42 = vector.load %arg7[%c0_28, %c0_29] : memref<8x1xf32, #tpu.memory_space<vmem>>, vector<8x1xf32>
      tpu.vector_store %arg7[%c0_28, %c0_29], %41 {strides = array<i32>} : memref<8x1xf32, #tpu.memory_space<vmem>>, vector<8x1xf32>,
    } else {
    }
    %c0 = arith.constant 0 : index
    %c0_1 = arith.constant 0 : index
    %3 = vector.load %arg3[%c0, %c0_1] : memref<8x32xf32, #tpu.memory_space<vmem>>, vector<8x32xf32>
    %c0_2 = arith.constant 0 : index
    %c0_3 = arith.constant 0 : index
    %4 = vector.load %arg2[%c0_2, %c0_3] : memref<8x1xi32, #tpu.memory_space<vmem>>, vector<8x1xi32>
    %c32_i32 = arith.constant 32 : i32
    %5 = arith.muli %arg1, %c32_i32 : i32
    %6 = vector.broadcast %5 : i32 to vector<8x1xi32>
    %7 = arith.subi %4, %6 : vector<8x1xi32>
    %8 = tpu.iota {dimensions = array<i32: 1>} : vector<8x32xi32>
    %9 = vector.broadcast %7 : vector<8x1xi32> to vector<8x32xi32>
    %10 = arith.cmpi eq, %8, %9 : vector<8x32xi32>
    %c0_4 = arith.constant 0 : index
    %c0_5 = arith.constant 0 : index
    %11 = vector.load %arg5[%c0_4, %c0_5] : memref<8x1xf32, #tpu.memory_space<vmem>>, vector<8x1xf32>
    %cst = arith.constant dense<0xFF800000> : vector<8xf32>
    %12 = vector.multi_reduction <maximumf>, %3, %cst [1] : vector<8x32xf32> to vector<8xf32>
    %13 = vector.shape_cast %12 : vector<8xf32> to vector<8x1xf32>
    %14 = arith.maximumf %11, %13 : vector<8x1xf32>
    %15 = vector.broadcast %14 : vector<8x1xf32> to vector<8x32xf32>
    %16 = arith.subf %3, %15 : vector<8x32xf32>
    %17 = math.exp %16 : vector<8x32xf32>
    %18 = arith.subf %11, %14 : vector<8x1xf32>
    %19 = math.exp %18 : vector<8x1xf32>
    %c0_6 = arith.constant 0 : index
    %c0_7 = arith.constant 0 : index
    %20 = vector.load %arg6[%c0_6, %c0_7] : memref<8x1xf32, #tpu.memory_space<vmem>>, vector<8x1xf32>
    %21 = arith.mulf %19, %20 : vector<8x1xf32>
    %cst_8 = arith.constant dense<0.000000e+00> : vector<8xf32>
    %22 = vector.multi_reduction <add>, %17, %cst_8 [1] : vector<8x32xf32> to vector<8xf32>
    %23 = vector.shape_cast %22 : vector<8xf32> to vector<8x1xf32>
    %24 = arith.addf %21, %23 : vector<8x1xf32>
    %c0_9 = arith.constant 0 : index
    %c0_10 = arith.constant 0 : index
    %25 = vector.load %arg6[%c0_9, %c0_10] : memref<8x1xf32, #tpu.memory_space<vmem>>, vector<8x1xf32>
    tpu.vector_store %arg6[%c0_9, %c0_10], %24 {strides = array<i32>} : memref<8x1xf32, #tpu.memory_space<vmem>>, vector<8x1xf32>,
    %c0_11 = arith.constant 0 : index
    %c0_12 = arith.constant 0 : index
    %26 = vector.load %arg7[%c0_11, %c0_12] : memref<8x1xf32, #tpu.memory_space<vmem>>, vector<8x1xf32>
    %cst_13 = arith.constant 0.000000e+00 : f32
    %27 = vector.broadcast %cst_13 : f32 to vector<8x32xf32>
    %28 = arith.select %10, %3, %27 : vector<8x32xi1>, vector<8x32xf32>
    %cst_14 = arith.constant dense<0.000000e+00> : vector<8xf32>
    %29 = vector.multi_reduction <add>, %28, %cst_14 [1] : vector<8x32xf32> to vector<8xf32>
    %30 = vector.shape_cast %29 : vector<8xf32> to vector<8x1xf32>
    %31 = arith.addf %26, %30 : vector<8x1xf32>
    %c0_15 = arith.constant 0 : index
    %c0_16 = arith.constant 0 : index
    %32 = vector.load %arg7[%c0_15, %c0_16] : memref<8x1xf32, #tpu.memory_space<vmem>>, vector<8x1xf32>
    tpu.vector_store %arg7[%c0_15, %c0_16], %31 {strides = array<i32>} : memref<8x1xf32, #tpu.memory_space<vmem>>, vector<8x1xf32>,
    %c0_17 = arith.constant 0 : index
    %c0_18 = arith.constant 0 : index
    %33 = vector.load %arg5[%c0_17, %c0_18] : memref<8x1xf32, #tpu.memory_space<vmem>>, vector<8x1xf32>
    tpu.vector_store %arg5[%c0_17, %c0_18], %14 {strides = array<i32>} : memref<8x1xf32, #tpu.memory_space<vmem>>, vector<8x1xf32>,
    %c0_i32_19 = arith.constant 0 : i32
    %34 = arith.cmpi eq, %arg1, %c0_i32_19 : i32
    %35 = arith.extui %34 : i1 to i32
    %c0_i32_20 = arith.constant 0 : i32
    %36 = arith.cmpi ne, %35, %c0_i32_20 : i32
    scf.if %36 {
      %c0_21 = arith.constant 0 : index
      %c0_22 = arith.constant 0 : index
      %37 = vector.load %arg6[%c0_21, %c0_22] : memref<8x1xf32, #tpu.memory_space<vmem>>, vector<8x1xf32>
      %38 = math.log %37 : vector<8x1xf32>
      %c0_23 = arith.constant 0 : index
      %c0_24 = arith.constant 0 : index
      %39 = vector.load %arg5[%c0_23, %c0_24] : memref<8x1xf32, #tpu.memory_space<vmem>>, vector<8x1xf32>
      %40 = arith.addf %38, %39 : vector<8x1xf32>
      %c0_25 = arith.constant 0 : index
      %c0_26 = arith.constant 0 : index
      %41 = vector.load %arg7[%c0_25, %c0_26] : memref<8x1xf32, #tpu.memory_space<vmem>>, vector<8x1xf32>
      %42 = arith.subf %40, %41 : vector<8x1xf32>
      %c0_27 = arith.constant 0 : index
      %c0_28 = arith.constant 0 : index
      %43 = vector.load %arg4[%c0_27, %c0_28] : memref<8x1xf32, #tpu.memory_space<vmem>>, vector<8x1xf32>
      tpu.vector_store %arg4[%c0_27, %c0_28], %42 {strides = array<i32>} : memref<8x1xf32, #tpu.memory_space<vmem>>, vector<8x1xf32>,
    } else {
    }
    return
  }
  func.func @transform_0(%arg0: i32, %arg1: i32) -> (i32, i32) {
    %c0_i32 = arith.constant 0 : i32
    %c0_i32_0 = arith.constant 0 : i32
    return %arg0, %c0_i32 : i32, i32
  }
  func.func @transform_1(%arg0: i32, %arg1: i32) -> (i32, i32) {
    %c0_i32 = arith.constant 0 : i32
    return %arg0, %arg1 : i32, i32
  }
  func.func @transform_2(%arg0: i32, %arg1: i32) -> (i32, i32) {
    %c0_i32 = arith.constant 0 : i32
    %c0_i32_0 = arith.constant 0 : i32
    return %arg0, %c0_i32 : i32, i32
  }
}

</mosaic_0001>

<bundles_post_ra>
// kernel: tpu_custom_call.1
= control target key start
LH: loop header
LB: loop body
LE: loop exit
PB: predicated region body
PF: predicated region fallthrough
CT: control target
= control target key end

     0   :  { %vm31_vm0 = vcmask 261120   ;;  %vm15_vm1 = vcmask 7168   ;;  %v89_v1 = vmov -inf   ;;  %v90_v3 = vmov 0   ;;  %s126_s1 = inlined_call_operand.vmem [shape: f32[8,32], index: 1, kind: input, shape index: {}]   ;;  %s127_s0 = inlined_call_operand.vmem [shape: s32[8,1], index: 0, kind: input, shape index: {}]   ;;  %s128_s2 = inlined_call_operand.vmem [shape: f32[8,1], index: 2, kind: output, shape index: {}]  }
   0x1   :  { %v19_v0 = vld [vmem:[%s126_s1] sm:$0xff]  ;;  %16 = vst.msk [vmem:[#allocation2] sm:$0xff] %vm15_vm1, %v89_v1  ;;  %81 = vset.pattern.permute.xlu0 %v90_v3  ;;  %82 = vset.pattern.permute.xlu1 %v90_v3  ;;  %v91_v4 = vmov 0.0   ;;  %v24_v13 = vlaneseq }
   0x2   :  { %v32_v2 = vsel %vm31_vm0, %v19_v0, -inf  ;;  %17 = vst.msk [vmem:[#allocation3] sm:$0xff] %vm15_vm1, %v91_v4  ;;  %18 = vst.msk [vmem:[#allocation4] sm:$0xff] %vm15_vm1, %v91_v4  ;;  %v20_v5 = vld [vmem:[%s127_s0] sm:$0xff] }
   0x3   :  { %33 = vmax.xlane.f32.xlu0 %v32_v2  ;;  %27 = vperm.xlu1 %82, %v20_v5   ;;  %v25_v14 = vand.u32 127, %v24_v13 }
   0x8   :  { %v30_v6 = vld [vmem:[#allocation2] sm:$0xff] }
   0x9   :  { %v47_v22 = vld [vmem:[#allocation3] sm:$0xff]  ;;  %v55_v26 = vld [vmem:[#allocation4] sm:$0xff] }
  0x82   :  { %v28_v15 = vpop.permute.xlu1 %27 }
  0x83   :  { %vm29_vm2 = vcmp.eq.s32.totalorder %v25_v14, %v28_v15 }
  0x84   :  { %v56_v17 = vsel %vm29_vm2, %v19_v0, 0.0 }
  0x85   :  { %v57_v19 = vsel %vm31_vm0, %v56_v17, 0.0 }
  0x90   :  { %v34_v7 = vpop.xlane.xlu0 %33 }
  0x91   :  { %v35_v8 = vmax.f32 %v30_v6, %v34_v7 }
  0x93   :  { %v44_v9 = vsub.f32 %v30_v6, %v35_v8  ;;  %62 = vst.msk [vmem:[#allocation2] sm:$0xff] %vm15_vm1, %v35_v8  ;;  %38 = vperm.xlu0 %81, %v35_v8  }
  0x95   :  { %v45_v20 = vmul.f32 1.442695, %v44_v9 }
  0x9a   :  { %v69_v32 = vld [vmem:[#allocation2] sm:$0xff] }
 0x112   :  { %v39_v10 = vpop.permute.xlu0 %38 }
 0x113   :  { %v41_v11 = vsub.f32 %v19_v0, %v39_v10 }
 0x115   :  { %v42_v12 = vmul.f32 1.442695, %v41_v11 }
 0x117   :  { %83 = vpow2.f32 %v42_v12 }
 0x118   :  { %85 = vpow2.f32 %v45_v20 }
 0x121   :  { %v84_v16 = vpop.eup %83 }
 0x122   :  { %v49_v18 = vsel %vm31_vm0, %v84_v16, 0.0  ;;  %v86_v21 = vpop.eup %85 }
 0x123   :  { %50 = vadd.xlane.f32.xlu1 %v49_v18  ;;  %v48_v23 = vmul.f32 %v86_v21, %v47_v22 }
 0x127   :  { %58 = vadd.xlane.f32.xlu1 %v57_v19 }
 0x1b0   :  { %v51_v24 = vpop.xlane.xlu1 %50 }
 0x1b1   :  { %v52_v25 = vadd.f32 %v51_v24, %v48_v23 }
 0x1b3   :  { %54 = vst.msk [vmem:[#allocation3] sm:$0xff] %vm15_vm1, %v52_v25 }
 0x1b4   :  { %v59_v27 = vpop.xlane.xlu1 %58 }
 0x1b5   :  { %v60_v28 = vadd.f32 %v59_v27, %v55_v26 }
 0x1b7   :  { %61 = vst.msk [vmem:[#allocation4] sm:$0xff] %vm15_vm1, %v60_v28 }
 0x1ba   :  { %v66_v29 = vld [vmem:[#allocation3] sm:$0xff] }
 0x1bb   :  { %87 = vlog2.f32 %v66_v29 }
 0x1be   :  { %v71_v33 = vld [vmem:[#allocation4] sm:$0xff] }
 0x1c5   :  { %v88_v30 = vpop.eup %87 }
 0x1c6   :  { %v68_v31 = vmul.f32 0.6931472, %v88_v30 }
 0x1c8   :  { %v70_v34 = vadd.f32 %v69_v32, %v68_v31 }
 0x1ca   :  { %v72_v35 = vsub.f32 %v70_v34, %v71_v33 }
 0x1cc   :  { %73 = vst.msk [vmem:[%s128_s2] sm:$0xff] %vm15_vm1, %v72_v35 }

</bundles_post_ra>
